<compile_context>
chip_gen: v7x
topology: tpu7x:2x2x1
jax: 0.10.0
libtpu: 0.0.40
codegen_flags: <defaults>
</compile_context>

<pallas_src>
import numpy as np

import jax
import jax.numpy as jnp
from jax.experimental import pallas as pl
from jax.experimental.pallas import tpu as pltpu

LANE = 128
# (4096, 128) f32 tile = 2 MiB; 2 inputs x 2 pipeline buffers = 8 MiB (f32) or
# 4 MiB (bf16) + ~1.5 KiB of accumulator scratch -- fits the 16 MiB v5e
# scoped-VMEM default and leaves headroom on v6e / v7x.
MAX_BLOCK_ROWS = 4096


def _confusion_sums_kernel(x_ref, t_ref, out_ref, teq_acc, eq_acc, t_acc):
    """Per batch b accumulates [sum(t*(p==t)), sum(p==t), sum(t)] over row-blocks."""
    b = pl.program_id(0)
    j = pl.program_id(1)

    @pl.when(j == 0)
    def _init():
        teq_acc[...] = jnp.zeros_like(teq_acc)
        eq_acc[...] = jnp.zeros_like(eq_acc)
        t_acc[...] = jnp.zeros_like(t_acc)

    # Native-dtype tiles streamed from HBM; cast in-register.
    x = x_ref[0].astype(jnp.float32)
    t = t_ref[0].astype(jnp.float32)
    p = jnp.where(x >= 0.5, 1.0, 0.0)      # thresholded prediction (0/1)
    eq = jnp.where(p == t, 1.0, 0.0)       # prediction == target (exact, like torch)

    # Hot loop: VPU elementwise + sublane-axis partial sums into one-vreg
    # accumulators (no full-tile accumulator writeback).
    teq_acc[...] += jnp.sum(t * eq, axis=0, keepdims=True)
    eq_acc[...] += jnp.sum(eq, axis=0, keepdims=True)
    t_acc[...] += jnp.sum(t, axis=0, keepdims=True)

    @pl.when(j == pl.num_programs(1) - 1)
    def _finalize():
        out_ref[b, 0] = jnp.sum(teq_acc[...])
        out_ref[b, 1] = jnp.sum(eq_acc[...])
        out_ref[b, 2] = jnp.sum(t_acc[...])


def _safe_div(num, denom):
    """num / denom if denom else 0.0 (elementwise)."""
    nz = denom != 0
    return jnp.where(nz, num / jnp.where(nz, denom, 1.0), 0.0)


def loss_all_batch(inputs, targets, smooth=1):
    """Pallas equivalent of Loss_all_batch.forward(inputs, targets, smooth)."""
    del smooth  # unused by the reference module as well
    B = inputs.shape[0]
    P = int(np.prod(inputs.shape[1:]))

    # Blocking geometry: flatten per batch and view as (rows, 128) lanes.
    rows = -(-P // LANE)
    if rows <= MAX_BLOCK_ROWS:
        block_rows = ((rows + 7) // 8) * 8              # multiple of 8 sublanes
        rows_padded = block_rows
    else:
        block_rows = MAX_BLOCK_ROWS
        rows_padded = -(-rows // block_rows) * block_rows
    padded_p = rows_padded * LANE
    pad = padded_p - P

    x = inputs.reshape(B, P)
    t = targets.reshape(B, P)
    if pad:
        # Zero padding is harmless: pred(0)=0 == target(0); the extra "equal"
        # hits are subtracted below with the static `pad` count.
        x = jnp.pad(x, ((0, 0), (0, pad)))
        t = jnp.pad(t, ((0, 0), (0, pad)))
    x = x.reshape(B, rows_padded, LANE)
    t = t.reshape(B, rows_padded, LANE)

    grid = (B, rows_padded // block_rows)
    tile = pl.BlockSpec((1, block_rows, LANE), lambda b, j: (b, j, 0))

    sums = pl.pallas_call(
        _confusion_sums_kernel,
        out_shape=jax.ShapeDtypeStruct((B, 3), jnp.float32),
        grid=grid,
        in_specs=[tile, tile],
        out_specs=pl.BlockSpec(memory_space=pltpu.SMEM),
        scratch_shapes=[pltpu.VMEM((1, LANE), jnp.float32)] * 3,
        compiler_params=pltpu.CompilerParams(
            dimension_semantics=("arbitrary", "arbitrary"),
            vmem_limit_bytes=32 * 1024 * 1024),
    )(x, t)

    n = jnp.float32(P)
    TP = sums[:, 0]
    n_eq = sums[:, 1] - jnp.float32(pad)   # drop padded (pred==target) hits
    sum_t = sums[:, 2]

    # Names follow the reference module (not standard confusion-matrix naming).
    TN = n_eq - TP
    FP = sum_t - TP
    FN = (n - n_eq) - FP

    precision = _safe_div(TP, TP + FP)
    recall = _safe_div(TP, TP + FN)
    FPR = _safe_div(FP, FP + TN)
    FNR = _safe_div(FN, FN + TP)
    return (jnp.mean(precision), jnp.mean(recall), jnp.mean(FPR), jnp.mean(FNR))


def _loss_all_batch_ref(inputs, targets):
    """Direct NumPy port of the PyTorch Loss_all_batch.forward."""
    x_all = np.asarray(inputs).astype(np.float32)
    t_all = np.asarray(targets).astype(np.float32)
    B = x_all.shape[0]

    def safe_div(num, denom):
        return num / denom if denom else 0.0

    precs, recs, fprs, fnrs = [], [], [], []
    for i in range(B):
        x = x_all[i].reshape(-1).copy()
        t = t_all[i].reshape(-1)
        x[x >= 0.5] = 1
        x[x < 0.5] = 0
        T_ = t[x == t]
        F_ = t[x != t]
        TP = T_.sum()
        TN = len(T_) - T_.sum()
        FP = F_.sum()
        FN = len(F_) - F_.sum()
        precs.append(safe_div(TP, TP + FP))
        recs.append(safe_div(TP, TP + FN))
        fprs.append(safe_div(FP, FP + TN))
        fnrs.append(safe_div(FN, FN + TP))
    return (np.mean(precs), np.mean(recs), np.mean(fprs), np.mean(fnrs))


if __name__ == "__main__":
    key = jax.random.PRNGKey(0)
    k1, k2, k3, k4 = jax.random.split(key, 4)

    # Test 1: f32 probabilities, NCHW (2, 4, 16, 16) -> 1024 elems/batch (no padding path).
    inputs = jax.random.uniform(k1, (2, 4, 16, 16), dtype=jnp.float32)
    targets = (jax.random.uniform(k2, (2, 4, 16, 16)) > 0.5).astype(jnp.float32)
    out = jax.block_until_ready(loss_all_batch(inputs, targets, smooth=1))
    ref = _loss_all_batch_ref(inputs, targets)
    for got, want in zip(out, ref):
        assert np.allclose(np.asarray(got), want, atol=1e-5, rtol=1e-5), (got, want)

    # Test 2: bf16 inputs streamed natively + ragged size (padding path), NCHW (2, 3, 10, 10).
    inputs2 = jax.random.uniform(k3, (2, 3, 10, 10), dtype=jnp.float32).astype(jnp.bfloat16)
    targets2 = (jax.random.uniform(k4, (2, 3, 10, 10)) > 0.5).astype(jnp.float32)
    out2 = jax.block_until_ready(loss_all_batch(inputs2, targets2, smooth=1))
    ref2 = _loss_all_batch_ref(inputs2, targets2)
    for got, want in zip(out2, ref2):
        assert np.allclose(np.asarray(got), want, atol=1e-5, rtol=1e-5), (got, want)

    print("KERNEL_OK")
</pallas_src>

<mosaic_0001>
module attributes {stable_mosaic.version = 11 : i64} {
  func.func @_confusion_sums_kernel(%arg0: i32, %arg1: i32, %arg2: memref<1x8x128xf32, #tpu.memory_space<vmem>>, %arg3: memref<1x8x128xf32, #tpu.memory_space<vmem>>, %arg4: memref<2x3xf32, #tpu.memory_space<smem>>, %arg5: memref<1x128xf32, #tpu.memory_space<vmem>>, %arg6: memref<1x128xf32, #tpu.memory_space<vmem>>, %arg7: memref<1x128xf32, #tpu.memory_space<vmem>>) attributes {dimension_semantics = [#tpu.dimension_semantics<arbitrary>, #tpu.dimension_semantics<arbitrary>], iteration_bounds = array<i64: 2, 1>, scalar_prefetch = 0 : i64, scratch_operands = 3 : i64, tpu.core_type = #tpu.core_type<tc>, window_params = [{transform_indices = @transform_0, window_bounds = array<i64: 1, 8, 128>}, {transform_indices = @transform_1, window_bounds = array<i64: 1, 8, 128>}, {transform_indices = @transform_2, window_bounds = array<i64: 2, 3>}]} {
    %c0_i32 = arith.constant 0 : i32
    %0 = arith.cmpi eq, %arg1, %c0_i32 : i32
    %1 = arith.extui %0 : i1 to i32
    %c0_i32_0 = arith.constant 0 : i32
    %2 = arith.cmpi ne, %1, %c0_i32_0 : i32
    scf.if %2 {
      %cst_27 = arith.constant 0.000000e+00 : f32
      %35 = vector.broadcast %cst_27 : f32 to vector<1x128xf32>
      %c0_28 = arith.constant 0 : index
      %c0_29 = arith.constant 0 : index
      %36 = vector.load %arg5[%c0_28, %c0_29] : memref<1x128xf32, #tpu.memory_space<vmem>>, vector<1x128xf32>
      tpu.vector_store %arg5[%c0_28, %c0_29], %35 {strides = array<i32>} : memref<1x128xf32, #tpu.memory_space<vmem>>, vector<1x128xf32>,
      %cst_30 = arith.constant 0.000000e+00 : f32
      %37 = vector.broadcast %cst_30 : f32 to vector<1x128xf32>
      %c0_31 = arith.constant 0 : index
      %c0_32 = arith.constant 0 : index
      %38 = vector.load %arg6[%c0_31, %c0_32] : memref<1x128xf32, #tpu.memory_space<vmem>>, vector<1x128xf32>
      tpu.vector_store %arg6[%c0_31, %c0_32], %37 {strides = array<i32>} : memref<1x128xf32, #tpu.memory_space<vmem>>, vector<1x128xf32>,
      %cst_33 = arith.constant 0.000000e+00 : f32
      %39 = vector.broadcast %cst_33 : f32 to vector<1x128xf32>
      %c0_34 = arith.constant 0 : index
      %c0_35 = arith.constant 0 : index
      %40 = vector.load %arg7[%c0_34, %c0_35] : memref<1x128xf32, #tpu.memory_space<vmem>>, vector<1x128xf32>
      tpu.vector_store %arg7[%c0_34, %c0_35], %39 {strides = array<i32>} : memref<1x128xf32, #tpu.memory_space<vmem>>, vector<1x128xf32>,
    } else {
    }
    %c0 = arith.constant 0 : index
    %c0_1 = arith.constant 0 : index
    %c0_2 = arith.constant 0 : index
    %3 = vector.load %arg2[%c0, %c0_1, %c0_2] : memref<1x8x128xf32, #tpu.memory_space<vmem>>, vector<1x8x128xf32>
    %4 = vector.shape_cast %3 : vector<1x8x128xf32> to vector<8x128xf32>
    %c0_3 = arith.constant 0 : index
    %c0_4 = arith.constant 0 : index
    %c0_5 = arith.constant 0 : index
    %5 = vector.load %arg3[%c0_3, %c0_4, %c0_5] : memref<1x8x128xf32, #tpu.memory_space<vmem>>, vector<1x8x128xf32>
    %6 = vector.shape_cast %5 : vector<1x8x128xf32> to vector<8x128xf32>
    %cst = arith.constant 5.000000e-01 : f32
    %7 = vector.broadcast %cst : f32 to vector<8x128xf32>
    %8 = arith.cmpf oge, %4, %7 : vector<8x128xf32>
    %cst_6 = arith.constant 1.000000e+00 : f32
    %cst_7 = arith.constant 0.000000e+00 : f32
    %9 = vector.broadcast %cst_6 : f32 to vector<8x128xf32>
    %10 = vector.broadcast %cst_7 : f32 to vector<8x128xf32>
    %11 = arith.select %8, %9, %10 : vector<8x128xi1>, vector<8x128xf32>
    %12 = arith.cmpf oeq, %11, %6 : vector<8x128xf32>
    %cst_8 = arith.constant 1.000000e+00 : f32
    %cst_9 = arith.constant 0.000000e+00 : f32
    %13 = vector.broadcast %cst_8 : f32 to vector<8x128xf32>
    %14 = vector.broadcast %cst_9 : f32 to vector<8x128xf32>
    %15 = arith.select %12, %13, %14 : vector<8x128xi1>, vector<8x128xf32>
    %c0_10 = arith.constant 0 : index
    %c0_11 = arith.constant 0 : index
    %16 = vector.load %arg5[%c0_10, %c0_11] : memref<1x128xf32, #tpu.memory_space<vmem>>, vector<1x128xf32>
    %17 = arith.mulf %6, %15 : vector<8x128xf32>
    %cst_12 = arith.constant dense<0.000000e+00> : vector<128xf32>
    %18 = vector.multi_reduction <add>, %17, %cst_12 [0] : vector<8x128xf32> to vector<128xf32>
    %19 = vector.shape_cast %18 : vector<128xf32> to vector<1x128xf32>
    %20 = arith.addf %16, %19 : vector<1x128xf32>
    %c0_13 = arith.constant 0 : index
    %c0_14 = arith.constant 0 : index
    %21 = vector.load %arg5[%c0_13, %c0_14] : memref<1x128xf32, #tpu.memory_space<vmem>>, vector<1x128xf32>
    tpu.vector_store %arg5[%c0_13, %c0_14], %20 {strides = array<i32>} : memref<1x128xf32, #tpu.memory_space<vmem>>, vector<1x128xf32>,
    %c0_15 = arith.constant 0 : index
    %c0_16 = arith.constant 0 : index
    %22 = vector.load %arg6[%c0_15, %c0_16] : memref<1x128xf32, #tpu.memory_space<vmem>>, vector<1x128xf32>
    %cst_17 = arith.constant dense<0.000000e+00> : vector<128xf32>
    %23 = vector.multi_reduction <add>, %15, %cst_17 [0] : vector<8x128xf32> to vector<128xf32>
    %24 = vector.shape_cast %23 : vector<128xf32> to vector<1x128xf32>
    %25 = arith.addf %22, %24 : vector<1x128xf32>
    %c0_18 = arith.constant 0 : index
    %c0_19 = arith.constant 0 : index
    %26 = vector.load %arg6[%c0_18, %c0_19] : memref<1x128xf32, #tpu.memory_space<vmem>>, vector<1x128xf32>
    tpu.vector_store %arg6[%c0_18, %c0_19], %25 {strides = array<i32>} : memref<1x128xf32, #tpu.memory_space<vmem>>, vector<1x128xf32>,
    %c0_20 = arith.constant 0 : index
    %c0_21 = arith.constant 0 : index
    %27 = vector.load %arg7[%c0_20, %c0_21] : memref<1x128xf32, #tpu.memory_space<vmem>>, vector<1x128xf32>
    %cst_22 = arith.constant dense<0.000000e+00> : vector<128xf32>
    %28 = vector.multi_reduction <add>, %6, %cst_22 [0] : vector<8x128xf32> to vector<128xf32>
    %29 = vector.shape_cast %28 : vector<128xf32> to vector<1x128xf32>
    %30 = arith.addf %27, %29 : vector<1x128xf32>
    %c0_23 = arith.constant 0 : index
    %c0_24 = arith.constant 0 : index
    %31 = vector.load %arg7[%c0_23, %c0_24] : memref<1x128xf32, #tpu.memory_space<vmem>>, vector<1x128xf32>
    tpu.vector_store %arg7[%c0_23, %c0_24], %30 {strides = array<i32>} : memref<1x128xf32, #tpu.memory_space<vmem>>, vector<1x128xf32>,
    %c0_i32_25 = arith.constant 0 : i32
    %32 = arith.cmpi eq, %arg1, %c0_i32_25 : i32
    %33 = arith.extui %32 : i1 to i32
    %c0_i32_26 = arith.constant 0 : i32
    %34 = arith.cmpi ne, %33, %c0_i32_26 : i32
    scf.if %34 {
      %c0_27 = arith.constant 0 : index
      %c0_28 = arith.constant 0 : index
      %35 = vector.load %arg5[%c0_27, %c0_28] : memref<1x128xf32, #tpu.memory_space<vmem>>, vector<1x128xf32>
      %36 = vector.shape_cast %35 : vector<1x128xf32> to vector<1x1x128xf32>
      %cst_29 = arith.constant dense<0.000000e+00> : vector<1xf32>
      %37 = vector.multi_reduction <add>, %36, %cst_29 [1, 2] : vector<1x1x128xf32> to vector<1xf32>
      %38 = vector.shape_cast %37 : vector<1xf32> to vector<1x1x1xf32>
      %39 = vector.extract %38[0, 0, 0] : f32 from vector<1x1x1xf32>
      %40 = arith.index_cast %arg0 : i32 to index
      %c0_30 = arith.constant 0 : index
      %41 = memref.load %arg4[%40, %c0_30] : memref<2x3xf32, #tpu.memory_space<smem>>
      memref.store %39, %arg4[%40, %c0_30] : memref<2x3xf32, #tpu.memory_space<smem>>
      %c0_31 = arith.constant 0 : index
      %c0_32 = arith.constant 0 : index
      %42 = vector.load %arg6[%c0_31, %c0_32] : memref<1x128xf32, #tpu.memory_space<vmem>>, vector<1x128xf32>
      %43 = vector.shape_cast %42 : vector<1x128xf32> to vector<1x1x128xf32>
      %cst_33 = arith.constant dense<0.000000e+00> : vector<1xf32>
      %44 = vector.multi_reduction <add>, %43, %cst_33 [1, 2] : vector<1x1x128xf32> to vector<1xf32>
      %45 = vector.shape_cast %44 : vector<1xf32> to vector<1x1x1xf32>
      %46 = vector.extract %45[0, 0, 0] : f32 from vector<1x1x1xf32>
      %47 = arith.index_cast %arg0 : i32 to index
      %c1 = arith.constant 1 : index
      %48 = memref.load %arg4[%47, %c1] : memref<2x3xf32, #tpu.memory_space<smem>>
      memref.store %46, %arg4[%47, %c1] : memref<2x3xf32, #tpu.memory_space<smem>>
      %c0_34 = arith.constant 0 : index
      %c0_35 = arith.constant 0 : index
      %49 = vector.load %arg7[%c0_34, %c0_35] : memref<1x128xf32, #tpu.memory_space<vmem>>, vector<1x128xf32>
      %50 = vector.shape_cast %49 : vector<1x128xf32> to vector<1x1x128xf32>
      %cst_36 = arith.constant dense<0.000000e+00> : vector<1xf32>
      %51 = vector.multi_reduction <add>, %50, %cst_36 [1, 2] : vector<1x1x128xf32> to vector<1xf32>
      %52 = vector.shape_cast %51 : vector<1xf32> to vector<1x1x1xf32>
      %53 = vector.extract %52[0, 0, 0] : f32 from vector<1x1x1xf32>
      %54 = arith.index_cast %arg0 : i32 to index
      %c2 = arith.constant 2 : index
      %55 = memref.load %arg4[%54, %c2] : memref<2x3xf32, #tpu.memory_space<smem>>
      memref.store %53, %arg4[%54, %c2] : memref<2x3xf32, #tpu.memory_space<smem>>
    } else {
    }
    return
  }
  func.func @transform_0(%arg0: i32, %arg1: i32) -> (i32, i32, i32) {
    %c0_i32 = arith.constant 0 : i32
    %c0_i32_0 = arith.constant 0 : i32
    return %arg0, %arg1, %c0_i32 : i32, i32, i32
  }
  func.func @transform_1(%arg0: i32, %arg1: i32) -> (i32, i32, i32) {
    %c0_i32 = arith.constant 0 : i32
    %c0_i32_0 = arith.constant 0 : i32
    return %arg0, %arg1, %c0_i32 : i32, i32, i32
  }
  func.func @transform_2(%arg0: i32, %arg1: i32) -> (i32, i32) {
    %c0_i32 = arith.constant 0 : i32
    %c0_i32_0 = arith.constant 0 : i32
    %c0_i32_1 = arith.constant 0 : i32
    return %c0_i32, %c0_i32_0 : i32, i32
  }
}

</mosaic_0001>

<bundles_post_ra>
// kernel: tpu_custom_call.1
= control target key start
LH: loop header
LB: loop body
LE: loop exit
PB: predicated region body
PF: predicated region fallthrough
CT: control target
= control target key end

     0   :  { %7 = vsyncpa [#allocation6], 0  ;;  %s825_s0 = inlined_call_operand.hbm [shape: f32[2,8,128], index: 0, kind: input, shape index: {}]   ;;  %s826_s1 = inlined_call_operand.hbm [shape: f32[2,8,128], index: 1, kind: input, shape index: {}]   ;;  %s827_s2 = inlined_call_operand.hbm [shape: f32[2,3], index: 2, kind: output, shape index: {}]  }
   0x1   :  { %9 = vsyncpa [#allocation6 + $0x1], 0 }
   0x2   :  { %10 = vsyncpa [#allocation9], 0 }
   0x3   :  { %12 = vsyncpa [#allocation9 + $0x1], 0 }
   0x4   :  { %13 = vsyncpa [#allocation7], 0  ;;  %s629_s9 = smov 0   ;;  %s631_s10 = smov 0  }
   0x5   :  { %s633_s11 = smov 0   ;;  %s635_s12 = smov 0  }
   0x6   :  { %s637_s13 = smov 0   ;;  %s639_s14 = smov 0  }
   0x7 LB: > { %s387_s15 = sadd.s32 4294967295, %s608_s14   ;;  %s31_s16 = sadd.s32 1, %s604_s13  ;;  %s608_s14 = sphi %s639_s14, %s19_s14   ;;  %s604_s13 = sphi %s637_s13, %s842_s13   ;;  %s600_s12 = sphi %s635_s12, %s841_s12   ;;  %s596_s11 = sphi %s633_s11, %s840_s11   ;;  %s592_s10 = sphi %s631_s10, %s839_s10   ;;  %s588_s9 = sphi %s629_s9, %s838_s9  }
   0x8   : > { %p33_p0 = scmp.ge.s32.totalorder %s31_s16, 2  ;;  %s40_s17 = sadd.s32 1, %s596_s11 }
   0x9   : > { %p47_p1 = scmp.ne.s32.totalorder %s596_s11, %s592_s10  ;;  %p48_p2 = scmp.eq.s32.totalorder %s608_s14, 0 }
   0xa   : > { %s844_s16 = smov (%p33_p0, %s31_s16), 0  ;;  %p53_p4 = scmp.ne.s32.totalorder %s592_s10, %s588_s9 }
   0xb   : > { %p665_p3 = por %p48_p2, %p47_p1  ;;  %s35_s19 = ssub.s32 %s604_s13, %s844_s16 }
   0xc   : > { %p54_p5 = scmp.eq.s32.totalorder %s387_s15, 0  ;;  %p38_p6 = scmp.eq.s32.totalorder %s35_s19, 0 }
   0xd   : > { %p425_p8 = scmp.lt.s32.totalorder %s608_s14, 2  ;;  %s683_s22 = sand.u32 1, %s596_s11  }
   0xe   : > { %p674_p7 = por %p54_p5, %p53_p4  ;;  %s391_s23 = sshll.u32 %s604_s13, 7 }
   0xf   : > { %s680_s21 = scalar_select %p38_p6, %s596_s11, %s40_s17  }
  0x10   : > { %s830_s20 = scalar_select %p674_p7, 1, 0 }
  0x11   : > { %s390_s24 = sshll.u32 %s683_s22, 3  ;;  %s692_s27 = scalar_lea.hbm %s825_s0, %s391_s23 }
  0x12   : > { %s130_s28 = scalar_lea.vmem [#allocation5], %s390_s24  ;;  %p698_p9 = pnand %p425_p8, %p665_p3 }
  0x13   : > { %s138_s29 = sshll.u32 %s130_s28, 4  ;;  %s127_s3 = scalar_lea.sflag [#allocation6], %s683_s22  ;;  %s702_s29 = int_to_ptr.vmem [resolvable:$true] %s138_s29 }
  0x14   : > { %s478_s4 = scalar_lea.hbm %s692_s27, 128  ;;  %p480_p13 = pneg %p698_p9 }
  0x15   : > { %p479_p12 = scmp.ne.s32.totalorder %s692_s27, %s478_s4  ;;  %s483_s7 = scalar_lea.hbm %s825_s0, 256 }
  0x16   : > { %p484_p2 = scmp.lt.u32.totalorder %s692_s27, %s825_s0  ;;  %p485_p3 = scmp.lt.u32.totalorder %s483_s7, %s478_s4 }
  0x17   : > { %p481_p0 = pnand %p480_p13, %p479_p12  ;;  %p487_p5 = scmp.lt.u32.totalorder %s478_s4, %s692_s27 }
  0x18   : > { %p486_p4 = por %p485_p3, %p484_p2 }
  0x19   : > { %p482_p1 = pneg %p481_p0 }
  0x1a   : > { %p488_p6 = por %p487_p5, %p486_p4 }
  0x1c   : > { %p489_p8 = pnand %p488_p6, %p482_p1 }
  0x1e   : > { %492 = shalt.err (!%p489_p8)
}
  0x1f   : > { %s493_s17 = scalar_lea.vmem %s702_s29, 128  ;;  %s610_s18 = smov [#allocation5]  }
  0x20   : > { %p494_p12 = scmp.ne.s32.totalorder %s702_s29, %s493_s17  ;;  %s498_s19 = sshll.u32 %s610_s18, 4  ;;  %s499_s19 = int_to_ptr.vmem [resolvable:$false] %s498_s19 }
  0x21   : > { %s500_s25 = scalar_lea.vmem %s499_s19, 256  ;;  %p501_p11 = scmp.lt.s32.totalorder %s702_s29, %s499_s19 }
  0x22   : > { %p496_p0 = pnand %p494_p12, %p480_p13  ;;  %p502_p2 = scmp.lt.s32.totalorder %s500_s25, %s493_s17 }
  0x24   : > { %p497_p10 = pneg %p496_p0  ;;  %p503_p3 = por %p502_p2, %p501_p11 }
  0x26   : > { %p504_p4 = pnand %p503_p3, %p497_p10 }
  0x28   : > { %507 = shalt.err (!%p504_p4)
}
  0x29   : > { %421 = dma.hbm_to_vmem [thread:$0]  (!%p698_p9), %s692_s27, 128, %s702_s29, %s127_s3  }
  0x2a   : > { %p832_p1 = scmp.lt.s32.totalorder %s608_s14, 3  ;;  %p833_p5 = scmp.ge.s32.totalorder %s608_s14, 1 }
  0x2b   : > { %s745_s5 = scalar_lea.hbm %s826_s1, %s391_s23  ;;  %s149_s6 = scalar_lea.vmem [#allocation8], %s390_s24 }
  0x2c   : > { %p736_p6 = pnand %p833_p5, %p832_p1  ;;  %s157_s7 = sshll.u32 %s149_s6, 4  ;;  %s158_s7 = int_to_ptr.vmem [resolvable:$true] %s157_s7 }
  0x2d   : > { %s146_s27 = scalar_lea.sflag [#allocation9], %s683_s22  ;;  %s508_s29 = scalar_lea.hbm %s745_s5, 128 }
  0x2e   : > { %s834_s26 = scalar_select %p736_p6, 1, 0 }
  0x2f   : > { %p509_p10 = scmp.ne.s32.totalorder %s745_s5, %s508_s29  ;;  %s513_s23 = scalar_lea.hbm %s826_s1, 256 }
  0x30   : > { %p514_p12 = scmp.lt.u32.totalorder %s745_s5, %s826_s1  ;;  %p515_p0 = scmp.lt.u32.totalorder %s513_s23, %s508_s29 }
  0x31   : > { %p511_p11 = pnand %p509_p10, %p480_p13  ;;  %p517_p3 = scmp.lt.u32.totalorder %s508_s29, %s745_s5 }
  0x32   : > { %p516_p2 = por %p515_p0, %p514_p12 }
  0x33   : > { %p512_p8 = pneg %p511_p11 }
  0x34   : > { %p518_p4 = por %p517_p3, %p516_p2 }
  0x36   : > { %p519_p1 = pnand %p518_p4, %p512_p8 }
  0x38   : > { %522 = shalt.err (!%p519_p1)
}
  0x39   : > { %s523_s22 = scalar_lea.vmem %s158_s7, 128  ;;  %s611_s24 = smov [#allocation8]  }
  0x3a   : > { %p524_p5 = scmp.ne.s32.totalorder %s158_s7, %s523_s22  ;;  %s528_s18 = sshll.u32 %s611_s24, 4  ;;  %s529_s18 = int_to_ptr.vmem [resolvable:$false] %s528_s18 }
  0x3b   : > { %s530_s19 = scalar_lea.vmem %s529_s18, 256  ;;  %p531_p7 = scmp.lt.s32.totalorder %s158_s7, %s529_s18 }
  0x3c   : > { %p526_p10 = pnand %p524_p5, %p480_p13  ;;  %p532_p6 = scmp.lt.s32.totalorder %s530_s19, %s523_s22 }
  0x3e   : > { %p527_p11 = pneg %p526_p10  ;;  %p533_p0 = por %p532_p6, %p531_p7 }
  0x40   : > { %p534_p12 = pnand %p533_p0, %p527_p11 }
  0x42   : > { %537 = shalt.err (!%p534_p12)
}
  0x43   : > { %424 = dma.hbm_to_vmem [thread:$0]  (!%p698_p9), %s745_s5, 128, %s158_s7, %s146_s27  }
  0x44   : > { %p835_p8 = scmp.ne.s32.totalorder %s834_s26, 0 }
  0x45   : > { %s168_s25 = sand.u32 (!%p835_p8), 1, %s592_s10   ;;  %p836_p13 = scmp.ne.s32.totalorder (!%p835_p8), %s830_s20, 0 }
  0x46   : > { %166 = sbr.rel (%p835_p8) target bundleno = 326 (0x146), region = 28  ;;  %s395_s28 = sshll.u32 (!%p835_p8), %s168_s25, 3 }
  0x47   : > { %s169_s4 = scalar_lea.sflag (!%p835_p8), [#allocation6], %s168_s25  ;;  %s172_s6 = scalar_lea.vmem (!%p835_p8), [#allocation5], %s395_s28 }
  0x4d   : > { %575 = dma.done.wait (%p836_p13), %s169_s4, 128  }
  0x4e   : > { %577 = vsyncadd (%p836_p13), %s169_s4, 4294967168  ;;  %s178_s29 = scalar_lea.sflag [#allocation9], %s168_s25  ;;  %s181_s3 = scalar_lea.vmem [#allocation8], %s395_s28 }
  0x4f   : > { %579 = dma.done.wait (%p836_p13), %s178_s29, 128  }
  0x50   : > { %581 = vsyncadd (%p836_p13), %s178_s29, 4294967168  ;;  %v612_v0 = vmov 0.0   ;;  %v209_v1 = vld [vmem:[%s172_s6] sm:$0xff]  ;;  %v210_v2 = vld [vmem:[%s181_s3] sm:$0xff]  ;;  %vm247_vm2 = vcmask 1040384   ;;  %s397_s20 = sshll.u32 %s600_s12, 7 }
  0x51   : > { %208 = vst [vmem:[#allocation4] sm:$0x1] %v612_v0  ;;  %206 = vst [vmem:[#allocation2] sm:$0x1] %v612_v0  ;;  %vm211_vm0 = vcmp.ge.f32.partialorder %v209_v1, 0.5  ;;  %v235_v3 = vrot.slane %v210_v2, 4 }
  0x52   : > { %207 = vst [vmem:[#allocation3] sm:$0x1] %v612_v0  ;;  %v212_v4 = vsel %vm211_vm0, 1.0, %v612_v0  ;;  %s259_s26 = scalar_lea.smem [#allocation10], %s397_s20  ;;  %p783_p7 = scmp.eq.s32.totalorder %s387_s15, 1 }
  0x53   : > { %v236_v5 = vadd.f32 %v235_v3, %v210_v2  ;;  %vm213_vm1 = vcmp.eq.f32.partialorder %v212_v4, %v210_v2  ;;  %s345_s5 = scalar_lea.smem %s259_s26, 1 [#allocation10]  ;;  %s348_s7 = scalar_lea.smem %s259_s26, 2 [#allocation10] }
  0x54   : > { %v214_v6 = vsel %vm213_vm1, 1.0, %v612_v0  ;;  %s538_s22 = scalar_lea.hbm %s827_s2, 32 }
  0x55   : > { %v237_v7 = vrot.slane %v236_v5, 2  ;;  %v216_v8 = vmul.f32 %v214_v6, %v210_v2  ;;  %v226_v9 = vrot.slane %v214_v6, 4  ;;  %p539_p9 = scmp.ne.s32.totalorder %s827_s2, %s538_s22  ;;  %p544_p3 = scmp.lt.u32.totalorder %s538_s22, %s827_s2 }
  0x57   : > { %v238_v10 = vadd.f32 %v237_v7, %v236_v5  ;;  %v217_v11 = vrot.slane %v216_v8, 4  ;;  %v227_v12 = vadd.f32 %v226_v9, %v214_v6  ;;  %p540_p6 = pnand %p539_p9, %p783_p7 }
  0x58   : > { %v234_v16 = vld [vmem:[#allocation4] sm:$0x1]  ;;  %v215_v26 = vld [vmem:[#allocation2] sm:$0x1] }
  0x59   : > { %v239_v13 = vrot.slane %v238_v10, 1  ;;  %v218_v14 = vadd.f32 %v217_v11, %v216_v8  ;;  %v228_v15 = vrot.slane %v227_v12, 2  ;;  %v225_v23 = vld [vmem:[#allocation3] sm:$0x1]  ;;  %p541_p2 = pneg %p540_p6 }
  0x5b   : > { %v240_v17 = vadd.f32 %v239_v13, %v238_v10  ;;  %v219_v18 = vrot.slane %v218_v14, 2  ;;  %v229_v19 = vadd.f32 %v228_v15, %v227_v12  ;;  %p546_p4 = pnand %p544_p3, %p541_p2 }
  0x5d   : > { %v241_v20 = vadd.f32 %v240_v17, %v234_v16  ;;  %v220_v21 = vadd.f32 %v219_v18, %v218_v14  ;;  %v230_v22 = vrot.slane %v229_v19, 1 }
  0x5f   : > { %242 = vst [vmem:[#allocation4] sm:$0x1] %v241_v20  ;;  %v221_v24 = vrot.slane %v220_v21, 1  ;;  %v231_v25 = vadd.f32 %v230_v22, %v229_v19 }
  0x61   : > { %v222_v27 = vadd.f32 %v221_v24, %v220_v21  ;;  %v232_v28 = vadd.f32 %v231_v25, %v225_v23 }
  0x63   : > { %v223_v29 = vadd.f32 %v222_v27, %v215_v26  ;;  %233 = vst [vmem:[#allocation3] sm:$0x1] %v232_v28 }
  0x65   : > { %224 = vst [vmem:[#allocation2] sm:$0x1] %v223_v29 }
  0x66   : > { %v275_v30 = vld [vmem:[#allocation4] sm:$0x1] }
  0x67   : > { %v276_v31 = vsel %vm247_vm2, %v275_v30, 0.0 }
  0x68   : > { %277 = vadd.xlane.f32.xlu1 %v276_v31 }
  0x6a   : > { %v261_v33 = vld [vmem:[#allocation3] sm:$0x1] }
  0x6b   : > { %v262_v35 = vsel %vm247_vm2, %v261_v33, 0.0 }
  0x6c   : > { %v246_v32 = vld [vmem:[#allocation2] sm:$0x1] }
  0x6d   : > { %v248_v34 = vsel %vm247_vm2, %v246_v32, 0.0 }
  0x6e   : > { %249 = vadd.xlane.f32.xlu0 %v248_v34 }
  0x72   : > { %263 = vadd.xlane.f32.xlu0 %v262_v35 }
  0xf5   : > { %v278_v36 = vpop.xlane.xlu1 %277 }
  0xf6   : > { %v279_v37 = vrot.slane %v278_v36, 4 }
  0xf8   : > { %v280_v38 = vadd.f32 %v279_v37, %v278_v36 }
  0xfa   : > { %v281_v42 = vrot.slane %v280_v38, 2 }
  0xfb   : > { %v250_v39 = vpop.xlane.xlu0 %249 }
  0xfc   : > { %v251_v40 = vrot.slane %v250_v39, 4  ;;  %v282_v48 = vadd.f32 %v281_v42, %v280_v38 }
  0xfe   : > { %v252_v41 = vadd.f32 %v251_v40, %v250_v39  ;;  %v283_v53 = vrot.slane %v282_v48, 1 }
  0xff   : > { %v264_v43 = vpop.xlane.xlu0 %263 }
 0x100   : > { %v253_v44 = vrot.slane %v252_v41, 2  ;;  %v265_v45 = vrot.slane %v264_v43, 4  ;;  %v284_v56 = vadd.f32 %v283_v53, %v282_v48 }
 0x102   : > { %v266_v46 = vadd.f32 %v265_v45, %v264_v43  ;;  %v254_v47 = vadd.f32 %v253_v44, %v252_v41 }
 0x104   : > { %v267_v49 = vrot.slane %v266_v46, 2  ;;  %v255_v50 = vrot.slane %v254_v47, 1 }
 0x106   : > { %v268_v51 = vadd.f32 %v267_v49, %v266_v46  ;;  %v256_v52 = vadd.f32 %v255_v50, %v254_v47 }
 0x108   : > { %404 = vpush %v256_v52  ;;  %v269_v54 = vrot.slane %v268_v51, 1 }
 0x10a   : > { %v270_v55 = vadd.f32 %v269_v54, %v268_v51 }
 0x10c   : > { %406 = vpush %v270_v55 }
 0x10d   : > { %408 = vpush %v284_v56 }
 0x139   : > { %s405_s30 = spop %404 }
 0x13a   : > { %260 = sst [smem:[%s259_s26]] %s405_s30 }
 0x13d   : > { %s407_s8 = spop %406 }
 0x13e   : > { %274 = sst [smem:[%s345_s5]] %s407_s8  ;;  %s409_s23 = spop %408 }
 0x13f   : > { %288 = sst [smem:[%s348_s7]] %s409_s23 }
 0x140   : > { %549 = shalt.err (!%p546_p4)
}
 0x141   : > { %s613_s19 = smov [#allocation10]  }
 0x142   : > { %415 = dma.smem_to_hbm (%p783_p7), %s613_s19, 32, %s827_s2, [#allocation7]  }
 0x143   : > { %583 = dma.done.wait (%p783_p7), [#allocation7], 32  }
 0x144   : > { %585 = vsyncadd (%p783_p7), [#allocation7], 4294967264 }
 0x145   : > { %302 = sfence }
 0x146 PF: > { %s19_s14 = sadd.s32 1, %s608_s14   ;;  %s838_s9 = smov %s592_s10 }
 0x147   : > { %p16_p1 = scmp.ge.s32.totalorder %s19_s14, 4   ;;  %s839_s10 = smov %s596_s11 }
 0x148   : > { %s840_s11 = smov %s680_s21  ;;  %s841_s12 = smov %s604_s13 }
 0x149   : > { %s842_s13 = smov %s844_s16  ;;  %18 = sbr.rel (!%p16_p1) target bundleno = 7 (0x7), region = 89 }
 0x150   :  { %308 = vsyncpa [#allocation6], 1 }
 0x151   :  { %310 = vsyncpa [#allocation6 + $0x1], 1 }
 0x152   :  { %311 = vsyncpa [#allocation9], 1 }
 0x153   :  { %313 = vsyncpa [#allocation9 + $0x1], 1 }
 0x154   :  { %314 = vsyncpa [#allocation7], 1 }
 0x155   :  { %316 = vsyncpa [#allocation7 + $0x1], 1 }

</bundles_post_ra>
